<compile_context>
chip_gen: v6e
topology: v6e:2x2x1
jax: 0.10.0
libtpu: 0.0.40
codegen_flags: <defaults>
</compile_context>

<pallas_src>
import jax
import jax.numpy as jnp
from jax.experimental import pallas as pl
from jax.experimental.pallas import tpu as pltpu


def _pca_noise_kernel(x_ref, noise_ref, o_ref):
    # x_ref:     VMEM (row_block, lane_block)  -- flattened image rows
    # noise_ref: VMEM (row_block, 1)           -- per-row (i.e. per-channel) noise
    # o_ref:     VMEM (row_block, lane_block)
    o_ref[...] = (x_ref[...] + noise_ref[...]).astype(o_ref.dtype)


def _pick_block(dim, align, cap):
    """Largest legal block for a dim: full dim if it fits under `cap`,
    otherwise the largest multiple of `align` that divides `dim` and is
    <= cap; falls back to the full dim (always legal per the (8,128) rule)."""
    if dim <= cap:
        return dim
    best = None
    b = align
    while b <= cap:
        if dim % b == 0:
            best = b
        b += align
    return best if best is not None else dim


def pca_random_noise(imgs, eigenvectors, eigenvalues, alpha):
    """imgs: (N, 3, H, W); eigenvectors: (3, 3); eigenvalues: (3, 1);
    alpha: (3, 1) pre-sampled ~ N(0, 0.01)."""
    N, C, H, W = imgs.shape
    assert C == 3

    # noise[c] = sum_j eigenvectors[c, j] * eigenvalues[j] * alpha[j]
    # Tiny 3x3 matmul: do it once in the wrapper (f32), not per grid step.
    noise_c = (
        eigenvectors.astype(jnp.float32)
        @ (eigenvalues.reshape(3, 1).astype(jnp.float32)
           * alpha.reshape(3, 1).astype(jnp.float32))
    ).reshape(3)

    NC, HW = N * C, H * W
    # Per-row noise table: rows of the flattened (N*C, H*W) image are laid out
    # channel-major within each image (NCHW), so row i -> channel i % 3.
    noise_rows = jnp.tile(noise_c, N).reshape(NC, 1).astype(imgs.dtype)

    x2d = imgs.reshape(NC, HW)
    itemsize = jnp.dtype(imgs.dtype).itemsize

    # Lane-dense last dim: big multiple of 128 (or the full H*W).
    lane_block = _pick_block(HW, 128, 16384)
    # Target ~2 MiB blocks -> (x + out) double-buffered stays well under the
    # v7x 64 MiB / default scoped VMEM limits while amortizing per-step cost.
    target_bytes = 2 * 1024 * 1024
    max_rows = max(8, target_bytes // max(1, lane_block * itemsize))
    row_block = _pick_block(NC, 8, max_rows)

    grid = (NC // row_block, HW // lane_block)

    out2d = pl.pallas_call(
        _pca_noise_kernel,
        out_shape=jax.ShapeDtypeStruct((NC, HW), imgs.dtype),
        grid=grid,
        in_specs=[
            pl.BlockSpec((row_block, lane_block), lambda i, j: (i, j)),
            pl.BlockSpec((row_block, 1), lambda i, j: (i, 0)),
        ],
        out_specs=pl.BlockSpec((row_block, lane_block), lambda i, j: (i, j)),
        compiler_params=pltpu.CompilerParams(
            dimension_semantics=("parallel", "parallel"),
            vmem_limit_bytes=64 << 20,
        ),
    )(x2d, noise_rows)

    return out2d.reshape(N, C, H, W)


if __name__ == "__main__":
    key = jax.random.PRNGKey(0)
    k_img, k_evec, k_eval, k_alpha = jax.random.split(key, 4)

    # Small, module-consistent shapes: batch=2, channels=3 (PCA over RGB), 16x16.
    N, C, H, W = 2, 3, 16, 16
    imgs = jax.random.normal(k_img, (N, C, H, W), dtype=jnp.float32)

    # Deterministic synthetic "PCA" parameters.
    eigenvectors = jax.random.normal(k_evec, (3, 3), dtype=jnp.float32)
    eigenvalues = jnp.abs(jax.random.normal(k_eval, (3, 1), dtype=jnp.float32))

    # torch.normal(0, 0.01, (3, 1)) equivalent, sampled in the wrapper (glue).
    alpha = 0.01 * jax.random.normal(k_alpha, (3, 1), dtype=jnp.float32)

    out = pca_random_noise(imgs, eigenvectors, eigenvalues, alpha)
    out = jax.block_until_ready(out)

    # Reference check in plain JAX.
    noise_ref = (eigenvectors @ (eigenvalues * alpha)).reshape(1, 3, 1, 1)
    expected = imgs + noise_ref
    assert jnp.allclose(out, expected, atol=1e-6), "mismatch vs reference"

    print("KERNEL_OK")
</pallas_src>

<mosaic_0001>
module attributes {stable_mosaic.version = 11 : i64} {
  func.func @_pca_noise_kernel(%arg0: i32, %arg1: i32, %arg2: memref<6x256xf32, #tpu.memory_space<vmem>>, %arg3: memref<6x1xf32, #tpu.memory_space<vmem>>, %arg4: memref<6x256xf32, #tpu.memory_space<vmem>>) attributes {dimension_semantics = [#tpu.dimension_semantics<parallel>, #tpu.dimension_semantics<parallel>], iteration_bounds = array<i64: 1, 1>, scalar_prefetch = 0 : i64, scratch_operands = 0 : i64, tpu.core_type = #tpu.core_type<tc>, window_params = [{transform_indices = @transform_0, window_bounds = array<i64: 6, 256>}, {transform_indices = @transform_1, window_bounds = array<i64: 6, 1>}, {transform_indices = @transform_2, window_bounds = array<i64: 6, 256>}]} {
    %c0 = arith.constant 0 : index
    %c0_0 = arith.constant 0 : index
    %0 = vector.load %arg2[%c0, %c0_0] : memref<6x256xf32, #tpu.memory_space<vmem>>, vector<6x256xf32>
    %c0_1 = arith.constant 0 : index
    %c0_2 = arith.constant 0 : index
    %1 = vector.load %arg3[%c0_1, %c0_2] : memref<6x1xf32, #tpu.memory_space<vmem>>, vector<6x1xf32>
    %2 = vector.broadcast %1 : vector<6x1xf32> to vector<6x256xf32>
    %3 = arith.addf %0, %2 : vector<6x256xf32>
    %c0_3 = arith.constant 0 : index
    %c0_4 = arith.constant 0 : index
    %4 = vector.load %arg4[%c0_3, %c0_4] : memref<6x256xf32, #tpu.memory_space<vmem>>, vector<6x256xf32>
    tpu.vector_store %arg4[%c0_3, %c0_4], %3 {strides = array<i32>} : memref<6x256xf32, #tpu.memory_space<vmem>>, vector<6x256xf32>,
    return
  }
  func.func @transform_0(%arg0: i32, %arg1: i32) -> (i32, i32) {
    %c0_i32 = arith.constant 0 : i32
    return %arg0, %arg1 : i32, i32
  }
  func.func @transform_1(%arg0: i32, %arg1: i32) -> (i32, i32) {
    %c0_i32 = arith.constant 0 : i32
    %c0_i32_0 = arith.constant 0 : i32
    return %arg0, %c0_i32 : i32, i32
  }
  func.func @transform_2(%arg0: i32, %arg1: i32) -> (i32, i32) {
    %c0_i32 = arith.constant 0 : i32
    return %arg0, %arg1 : i32, i32
  }
}

</mosaic_0001>

<bundles_post_ra>
// kernel: tpu_custom_call.1
= control target key start
LH: loop header
LB: loop body
LE: loop exit
PB: predicated region body
PF: predicated region fallthrough
CT: control target
= control target key end

     0   :  { %7 = vsyncpa [#allocation3], 0  ;;  %s126_s0 = inlined_call_operand.hbm [shape: f32[6,256], index: 0, kind: input, shape index: {}]   ;;  %s127_s1 = inlined_call_operand.vmem [shape: f32[6,1], index: 1, kind: input, shape index: {}]   ;;  %s128_s2 = inlined_call_operand.hbm [shape: f32[6,256], index: 2, kind: output, shape index: {}]  }
   0x1   :  { %8 = vsyncpa [#allocation4], 0  ;;  %s99_s9 = smov [#allocation2]  }
   0x2   :  { %s15_s10 = sshll.u32 %s99_s9, 4  ;;  %s16_s10 = int_to_ptr.vmem [resolvable:$true] %s15_s10 }
   0x3   :  { %s63_s11 = scalar_lea.vmem %s16_s10, 256  ;;  %p68_p1 = scmp.lt.s32.totalorder %s16_s10, %s16_s10 }
   0x4   :  { %p64_p0 = scmp.ne.s32.totalorder %s16_s10, %s63_s11  ;;  %p69_p2 = scmp.lt.s32.totalorder %s63_s11, %s63_s11 }
   0x6   :  { %p70_p3 = por %p69_p2, %p68_p1 }
   0x8   :  { %p71_p4 = pnand %p70_p3, %p64_p0 }
   0xa   :  { %74 = shalt.err (!%p71_p4)
}
   0xb   :  { %18 = dma.hbm_to_vmem [thread:$0]  %s126_s0, 256, %s16_s10, [#allocation3]  }
   0xc   :  { %95 = dma.done.wait [#allocation3], 256  }
   0xd   :  { %96 = vsyncadd [#allocation3], 4294967040  ;;  %v100_v0 = vmov 0   ;;  %v26_v1 = vld [vmem:[%s127_s1] sm:$0x3f]  ;;  %s101_s16 = smov [#allocation5]  }
   0xe   :  { %54 = vset.pattern.permute.xlu0 %v100_v0  ;;  %v24_v2 = vld [vmem:[#allocation2] sm:$0x3f]  ;;  %v25_v3 = vld [vmem:[#allocation2 + $0x8] sm:$0x3f]  ;;  %s42_s17 = sshll.u32 %s101_s16, 4  ;;  %s43_s17 = int_to_ptr.vmem [resolvable:$true] %s42_s17 }
   0xf   :  { %29 = vperm.xlu0 %54, %v26_v1   ;;  %s75_s0 = scalar_lea.vmem %s43_s17, 256  ;;  %p80_p6 = scmp.lt.s32.totalorder %s43_s17, %s43_s17 }
  0x10   :  { %p76_p5 = scmp.ne.s32.totalorder %s43_s17, %s75_s0  ;;  %p81_p7 = scmp.lt.s32.totalorder %s75_s0, %s75_s0 }
  0x12   :  { %p82_p8 = por %p81_p7, %p80_p6 }
  0x14   :  { %p83_p9 = pnand %p82_p8, %p76_p5 }
  0x8a   :  { %v30_v4 = vpop.permute.xlu0 %29 }
  0x8b   :  { %v32_v5 = vadd.f32 %v30_v4, %v24_v2  ;;  %v33_v6 = vadd.f32 %v30_v4, %v25_v3 }
  0x8d   :  { %34 = vst [vmem:[#allocation5] sm:$0x3f] %v32_v5  ;;  %35 = vst [vmem:[#allocation5 + $0x8] sm:$0x3f] %v33_v6 }
  0x8e   :  { %86 = shalt.err (!%p83_p9)
}
  0x8f   :  { %45 = dma.vmem_to_hbm [thread:$0]  %s43_s17, 256, %s128_s2, [#allocation4]  }
  0x90   :  { %97 = dma.done.wait [#allocation4], 256  }
  0x91   :  { %98 = vsyncadd [#allocation4], 4294967040 }
  0x92   :  { %49 = vsyncpa [#allocation3], 1 }
  0x93   :  { %50 = vsyncpa [#allocation4], 1 }

</bundles_post_ra>
